<compile_context>
chip_gen: v7x
topology: tpu7x:2x2x1
jax: 0.10.0
libtpu: 0.0.40
codegen_flags: <defaults>
</compile_context>

<pallas_src>
import functools
import math

import jax
import jax.numpy as jnp
from jax.experimental import pallas as pl
from jax.experimental.pallas import tpu as pltpu


def _round_up(x, m):
    return (x + m - 1) // m * m


# ----------------------------------------------------------------------------
# Pallas kernel 1: tiled matmul  Y = act(X @ W + b)
#   X: (M, K) bf16   W: (K, N) bf16   b: (1, N) f32   Y: (M, N) f32
#   f32 accumulation in VMEM scratch; fused bias + activation epilogue in f32.
# ----------------------------------------------------------------------------
def _mm_kernel(x_ref, w_ref, b_ref, o_ref, acc_ref, *, act):
    @pl.when(pl.program_id(2) == 0)
    def _():
        acc_ref[...] = jnp.zeros_like(acc_ref)

    acc_ref[...] += jnp.dot(x_ref[...], w_ref[...],
                            preferred_element_type=jnp.float32)

    @pl.when(pl.program_id(2) == pl.num_programs(2) - 1)
    def _():
        y = acc_ref[...] + b_ref[...]
        if act == "relu":
            y = jnp.maximum(y, 0.0)
        elif act == "tanh":
            y = jnp.tanh(y)
        o_ref[...] = y.astype(o_ref.dtype)


def _pick_fc_tk(K):
    """Weight-streaming K tile near 2048, preferring exact divisors of K."""
    if K < 2048:
        return _round_up(K, 128)
    for cand in (2048, 2304, 1792, 1536, 1280, 1024):
        if K % cand == 0:
            return cand
    return 2048


def prep_linear(w_t, b, *, fc):
    """One-time prep of a Linear layer: transpose already done by caller,
    pad to tile-aligned shapes, cast weight to bf16, keep bias in f32.

    w_t: (K, N) f32.  Returns dict with weight/bias + static tile config.
    """
    K, N = w_t.shape
    if fc:
        # M = batch (tiny) -> pure weight streaming: large K/N tiles to cut
        # grid-step overhead, 512-wide lane-dense output stores where possible.
        tk = _pick_fc_tk(K)
        tn = 512 if N >= 512 else _round_up(N, 128)
    else:
        # conv/im2col path: MXU-friendly multiples of 256 / 128.
        tk = min(_round_up(K, 256), 2048)
        tn = min(_round_up(N, 128), 256)
    Kp, Np = _round_up(K, tk), _round_up(N, tn)
    wp = jnp.pad(w_t, ((0, Kp - K), (0, Np - N))).astype(jnp.bfloat16)
    bvec = jnp.zeros((N,), jnp.float32) if b is None else b.astype(jnp.float32)
    bp = jnp.pad(bvec.reshape(1, -1), ((0, 0), (0, Np - N)))
    return {"w": wp, "b": bp, "K": K, "N": N, "tk": tk, "tn": tn}


def pallas_linear(x, lin, act="none"):
    """x: (M, K) f32 -> act(x @ W + b): (M, N) f32 via the Pallas MXU kernel."""
    M, K = x.shape
    assert K == lin["K"]
    tk, tn = lin["tk"], lin["tn"]
    Kp, Np = lin["w"].shape
    tm = min(_round_up(M, 16), 128)        # bf16 sublane packing: 16-row min
    Mp = _round_up(M, tm)
    if Mp != M or Kp != K:
        x = jnp.pad(x, ((0, Mp - M), (0, Kp - K)))
    xp = x.astype(jnp.bfloat16)

    out = pl.pallas_call(
        functools.partial(_mm_kernel, act=act),
        out_shape=jax.ShapeDtypeStruct((Mp, Np), jnp.float32),
        grid_spec=pltpu.PrefetchScalarGridSpec(
            num_scalar_prefetch=0,
            grid=(Mp // tm, Np // tn, Kp // tk),
            in_specs=[
                pl.BlockSpec((tm, tk), lambda i, j, k: (i, k)),
                pl.BlockSpec((tk, tn), lambda i, j, k: (k, j)),
                pl.BlockSpec((1, tn), lambda i, j, k: (0, j)),
            ],
            out_specs=pl.BlockSpec((tm, tn), lambda i, j, k: (i, j)),
            scratch_shapes=[pltpu.VMEM((tm, tn), jnp.float32)],
        ),
        compiler_params=pltpu.CompilerParams(
            dimension_semantics=("parallel", "parallel", "arbitrary"),
            vmem_limit_bytes=32 * 1024 * 1024),
    )(xp, lin["w"], lin["b"])

    if Mp != M or Np != lin["N"]:
        out = out[:M, :lin["N"]]           # no-op (and skipped) when aligned
    return out


# ----------------------------------------------------------------------------
# Pallas kernel 2: EuclideanDistance + row-sum normalize (x_laten_q)
#   dist = sqrt(max(-2 t1 t2^T + |t1|^2 + |t2|^2, 0));  q = dist / sum(dist,-1)
# ----------------------------------------------------------------------------
def _euclid_q_kernel(t1_ref, t2_ref, q_ref):
    t1 = t1_ref[...]
    t2 = t2_ref[...]
    d = -2.0 * jax.lax.dot_general(
        t1, t2, (((1,), (1,)), ((), ())), preferred_element_type=jnp.float32)
    d = d + jnp.sum(t1 * t1, axis=-1, keepdims=True)
    d = d + jnp.sum(t2 * t2, axis=-1)[None, :]
    d = jnp.sqrt(jnp.maximum(d, 0.0))      # clamp FP cancellation -> no NaN
    s = jnp.sum(d, axis=-1, keepdims=True)
    q_ref[...] = d / s


def pallas_euclid_q(t1, t2):
    N, C = t1.shape
    M = t2.shape[0]
    return pl.pallas_call(
        _euclid_q_kernel,
        out_shape=jax.ShapeDtypeStruct((N, M), jnp.float32),
        grid=(1,),
        in_specs=[pl.BlockSpec((N, C), lambda i: (0, 0)),
                  pl.BlockSpec((M, C), lambda i: (0, 0))],
        out_specs=pl.BlockSpec((N, M), lambda i: (0, 0)),
    )(t1, t2)


# ----------------------------------------------------------------------------
# Glue: im2col, maxpool, adaptive avg-pool (plain JAX; small trace-time loops)
# ----------------------------------------------------------------------------
def _im2col(x, kh, kw, stride, pad):
    """x: (B, C, H, W) -> (B*oh*ow, C*kh*kw), channel-major then (i, j)."""
    x = jnp.pad(x, ((0, 0), (0, 0), (pad, pad), (pad, pad)))
    B, C, H, W = x.shape
    oh = (H - kh) // stride + 1
    ow = (W - kw) // stride + 1
    cols = []
    for i in range(kh):
        for j in range(kw):
            cols.append(x[:, :, i:i + stride * oh:stride, j:j + stride * ow:stride])
    col = jnp.stack(cols, axis=2)                   # (B, C, kh*kw, oh, ow)
    col = col.reshape(B, C * kh * kw, oh * ow)
    col = col.transpose(0, 2, 1).reshape(B * oh * ow, C * kh * kw)
    return col, oh, ow


def conv2d_pallas(x, lin, act="relu"):
    """x: (B, C, H, W); lin: prepared conv layer (im2col weight layout)."""
    B = x.shape[0]
    cols, oh, ow = _im2col(x, lin["kh"], lin["kw"], lin["stride"], lin["pad"])
    y = pallas_linear(cols, lin, act=act)           # (B*oh*ow, OC)
    return y.reshape(B, oh, ow, lin["N"]).transpose(0, 3, 1, 2)


def maxpool2d(x, k=3, s=2):
    B, C, H, W = x.shape
    oh = (H - k) // s + 1
    ow = (W - k) // s + 1
    out = None
    for i in range(k):
        for j in range(k):
            p = x[:, :, i:i + s * oh:s, j:j + s * ow:s]
            out = p if out is None else jnp.maximum(out, p)
    return out


def adaptive_avg_pool(x, out_h=6, out_w=6):
    B, C, H, W = x.shape
    rows = []
    for i in range(out_h):
        h0, h1 = (i * H) // out_h, -(-((i + 1) * H) // out_h)
        cols = []
        for j in range(out_w):
            w0, w1 = (j * W) // out_w, -(-((j + 1) * W) // out_w)
            cols.append(jnp.mean(x[:, :, h0:h1, w0:w1], axis=(2, 3)))
        rows.append(jnp.stack(cols, axis=-1))
    return jnp.stack(rows, axis=-2)                 # (B, C, out_h, out_w)


# ----------------------------------------------------------------------------
# DeepHashingNet forward (AlexNet features + avgpool + classifier[:6] + hash)
# ----------------------------------------------------------------------------
def deep_hashing_forward(p, x):
    x = conv2d_pallas(x, p["conv1"], "relu")
    x = maxpool2d(x, 3, 2)
    x = conv2d_pallas(x, p["conv2"], "relu")
    x = maxpool2d(x, 3, 2)
    x = conv2d_pallas(x, p["conv3"], "relu")
    x = conv2d_pallas(x, p["conv4"], "relu")
    x = conv2d_pallas(x, p["conv5"], "relu")
    x = maxpool2d(x, 3, 2)
    x = adaptive_avg_pool(x, 6, 6)                  # (B, 256, 6, 6)
    x = x.reshape(x.shape[0], -1)                   # torch.flatten(x, 1)
    # classifier[0]: Dropout (identity), [1]: Linear(9216,4096), [2]: ReLU
    x = pallas_linear(x, p["fc1"], act="relu")
    # classifier[3]: Dropout (identity), [4]: Linear(4096,4096), [5]: ReLU
    x = pallas_linear(x, p["fc2"], act="relu")
    # hash_layer: Linear(4096, hash_bit) + Tanh
    x_hash = pallas_linear(x, p["hash"], act="tanh")
    return x_hash


def my_hash_forward(p, x, x_features=None):
    x_hash = deep_hashing_forward(p, x)
    if x_features is not None:
        # x_laten_c is param-only and hoisted (precomputed once in prepare).
        x_laten_q = pallas_euclid_q(x_hash, p["x_laten_c"])
        # TODO(synk): x_reconstruct1, x_target_q = multilabelnet(x_features) is
        #             not reproducible (external, unspecified module).
        return x_hash, x_laten_q
    return x_hash


# ----------------------------------------------------------------------------
# Deterministic parameter init (shapes from AlexNet / my_hash __init__)
# ----------------------------------------------------------------------------
def init_params(key, hash_bit, laten_dim, n_clusters):
    keys = jax.random.split(key, 10)

    def conv_init(k, oc, ic, kh, kw):
        k1, k2 = jax.random.split(k)
        s = 1.0 / math.sqrt(ic * kh * kw)
        return (jax.random.uniform(k1, (oc, ic, kh, kw), jnp.float32, -s, s),
                jax.random.uniform(k2, (oc,), jnp.float32, -s, s))

    def lin_init(k, outf, inf, bias=True):
        k1, k2 = jax.random.split(k)
        s = 1.0 / math.sqrt(inf)
        w = jax.random.uniform(k1, (outf, inf), jnp.float32, -s, s)
        b = jax.random.uniform(k2, (outf,), jnp.float32, -s, s) if bias else None
        return w, b

    p = {}
    p["conv1_w"], p["conv1_b"] = conv_init(keys[0], 64, 3, 11, 11)
    p["conv2_w"], p["conv2_b"] = conv_init(keys[1], 192, 64, 5, 5)
    p["conv3_w"], p["conv3_b"] = conv_init(keys[2], 384, 192, 3, 3)
    p["conv4_w"], p["conv4_b"] = conv_init(keys[3], 256, 384, 3, 3)
    p["conv5_w"], p["conv5_b"] = conv_init(keys[4], 256, 256, 3, 3)
    p["fc1_w"], p["fc1_b"] = lin_init(keys[5], 4096, 256 * 6 * 6)
    p["fc2_w"], p["fc2_b"] = lin_init(keys[6], 4096, 4096)
    p["hash_w"], p["hash_b"] = lin_init(keys[7], hash_bit, 4096)
    p["laten_w"], _ = lin_init(keys[8], hash_bit, laten_dim, bias=False)
    # stand-in for multilabelnet.cluster_layer parameter
    p["cluster_layer"] = jax.random.normal(keys[9], (n_clusters, laten_dim),
                                           jnp.float32)
    return p


def prepare_params(raw):
    """One-time conversion: PyTorch-layout params -> Pallas-ready layers
    (transposed, tile-padded, bf16 weights; padded f32 biases) and hoisted
    param-only computations (x_laten_c)."""
    p = {}

    def conv(name, stride, pad):
        w, b = raw[name + "_w"], raw[name + "_b"]
        oc, c, kh, kw = w.shape
        lin = prep_linear(w.reshape(oc, c * kh * kw).T, b, fc=False)
        lin.update(kh=kh, kw=kw, stride=stride, pad=pad)
        p[name] = lin

    conv("conv1", 4, 2)
    conv("conv2", 1, 2)
    conv("conv3", 1, 1)
    conv("conv4", 1, 1)
    conv("conv5", 1, 1)
    p["fc1"] = prep_linear(raw["fc1_w"].T, raw["fc1_b"], fc=True)
    p["fc2"] = prep_linear(raw["fc2_w"].T, raw["fc2_b"], fc=True)
    p["hash"] = prep_linear(raw["hash_w"].T, raw["hash_b"], fc=True)
    # x_laten_c = laten_feats_layer(multilabelnet.cluster_layer): depends only
    # on parameters, so compute it exactly once here instead of per forward.
    laten_lin = prep_linear(raw["laten_w"].T, None, fc=True)
    p["x_laten_c"] = pallas_linear(raw["cluster_layer"], laten_lin, act="none")
    return p


if __name__ == "__main__":
    HASH_BIT = 32
    LATEN_DIM = 64
    N_CLUSTERS = 8
    B = 2
    # Smallest spatial size that survives AlexNet's strides/pools: 63x63.
    key = jax.random.PRNGKey(0)
    k_x, k_p, k_f = jax.random.split(key, 3)
    x = jax.random.normal(k_x, (B, 3, 63, 63), jnp.float32)
    x_features = jax.random.normal(k_f, (B, LATEN_DIM), jnp.float32)
    raw_params = init_params(k_p, HASH_BIT, LATEN_DIM, N_CLUSTERS)
    params = prepare_params(raw_params)

    # Branch 1: x_features is None -> returns x_hash only
    x_hash = jax.block_until_ready(my_hash_forward(params, x))
    assert x_hash.shape == (B, HASH_BIT)
    assert bool(jnp.all(jnp.isfinite(x_hash)))

    # Branch 2: x_features given -> x_hash + x_laten_q (Euclidean-distance head)
    x_hash2, x_laten_q = my_hash_forward(params, x, x_features=x_features)
    jax.block_until_ready((x_hash2, x_laten_q))
    assert x_hash2.shape == (B, HASH_BIT)
    assert x_laten_q.shape == (B, N_CLUSTERS)
    assert bool(jnp.all(jnp.isfinite(x_laten_q)))

    print("KERNEL_OK")
</pallas_src>

<mosaic_0001>
module attributes {stable_mosaic.version = 11 : i64} {
  func.func @_mm_kernel(%arg0: i32, %arg1: i32, %arg2: i32, %arg3: memref<16x128xbf16, #tpu.memory_space<vmem>>, %arg4: memref<128x128xbf16, #tpu.memory_space<vmem>>, %arg5: memref<1x128xf32, #tpu.memory_space<vmem>>, %arg6: memref<16x128xf32, #tpu.memory_space<vmem>>, %arg7: memref<16x128xf32, #tpu.memory_space<vmem>>) attributes {dimension_semantics = [#tpu.dimension_semantics<parallel>, #tpu.dimension_semantics<parallel>, #tpu.dimension_semantics<arbitrary>], iteration_bounds = array<i64: 1, 1, 1>, scalar_prefetch = 0 : i64, scratch_operands = 1 : i64, tpu.core_type = #tpu.core_type<tc>, window_params = [{transform_indices = @transform_0, window_bounds = array<i64: 16, 128>}, {transform_indices = @transform_1, window_bounds = array<i64: 128, 128>}, {transform_indices = @transform_2, window_bounds = array<i64: 1, 128>}, {transform_indices = @transform_3, window_bounds = array<i64: 16, 128>}]} {
    %c0_i32 = arith.constant 0 : i32
    %0 = arith.cmpi eq, %arg2, %c0_i32 : i32
    %1 = arith.extui %0 : i1 to i32
    %c0_i32_0 = arith.constant 0 : i32
    %2 = arith.cmpi ne, %1, %c0_i32_0 : i32
    scf.if %2 {
      %cst_10 = arith.constant 0.000000e+00 : f32
      %12 = vector.broadcast %cst_10 : f32 to vector<16x128xf32>
      %c0_11 = arith.constant 0 : index
      %c0_12 = arith.constant 0 : index
      %13 = vector.load %arg7[%c0_11, %c0_12] : memref<16x128xf32, #tpu.memory_space<vmem>>, vector<16x128xf32>
      tpu.vector_store %arg7[%c0_11, %c0_12], %12 {strides = array<i32>} : memref<16x128xf32, #tpu.memory_space<vmem>>, vector<16x128xf32>,
    } else {
    }
    %c0 = arith.constant 0 : index
    %c0_1 = arith.constant 0 : index
    %3 = vector.load %arg7[%c0, %c0_1] : memref<16x128xf32, #tpu.memory_space<vmem>>, vector<16x128xf32>
    %c0_2 = arith.constant 0 : index
    %c0_3 = arith.constant 0 : index
    %4 = vector.load %arg3[%c0_2, %c0_3] : memref<16x128xbf16, #tpu.memory_space<vmem>>, vector<16x128xbf16>
    %c0_4 = arith.constant 0 : index
    %c0_5 = arith.constant 0 : index
    %5 = vector.load %arg4[%c0_4, %c0_5] : memref<128x128xbf16, #tpu.memory_space<vmem>>, vector<128x128xbf16>
    %cst = arith.constant dense<0.000000e+00> : vector<16x128xf32>
    %6 = tpu.matmul %4, %5, %cst {dimension_numbers = #tpu.dot_dimension_numbers<[1], [0], [0], [1], [0, 0, 1, 1], [], []>} : vector<16x128xbf16>, vector<128x128xbf16>, vector<16x128xf32> -> vector<16x128xf32>
    %7 = arith.addf %3, %6 : vector<16x128xf32>
    %c0_6 = arith.constant 0 : index
    %c0_7 = arith.constant 0 : index
    %8 = vector.load %arg7[%c0_6, %c0_7] : memref<16x128xf32, #tpu.memory_space<vmem>>, vector<16x128xf32>
    tpu.vector_store %arg7[%c0_6, %c0_7], %7 {strides = array<i32>} : memref<16x128xf32, #tpu.memory_space<vmem>>, vector<16x128xf32>,
    %c0_i32_8 = arith.constant 0 : i32
    %9 = arith.cmpi eq, %arg2, %c0_i32_8 : i32
    %10 = arith.extui %9 : i1 to i32
    %c0_i32_9 = arith.constant 0 : i32
    %11 = arith.cmpi ne, %10, %c0_i32_9 : i32
    scf.if %11 {
      %c0_10 = arith.constant 0 : index
      %c0_11 = arith.constant 0 : index
      %12 = vector.load %arg7[%c0_10, %c0_11] : memref<16x128xf32, #tpu.memory_space<vmem>>, vector<16x128xf32>
      %c0_12 = arith.constant 0 : index
      %c0_13 = arith.constant 0 : index
      %13 = vector.load %arg5[%c0_12, %c0_13] : memref<1x128xf32, #tpu.memory_space<vmem>>, vector<1x128xf32>
      %14 = vector.broadcast %13 : vector<1x128xf32> to vector<16x128xf32>
      %15 = arith.addf %12, %14 : vector<16x128xf32>
      %c0_14 = arith.constant 0 : index
      %c0_15 = arith.constant 0 : index
      %16 = vector.load %arg6[%c0_14, %c0_15] : memref<16x128xf32, #tpu.memory_space<vmem>>, vector<16x128xf32>
      tpu.vector_store %arg6[%c0_14, %c0_15], %15 {strides = array<i32>} : memref<16x128xf32, #tpu.memory_space<vmem>>, vector<16x128xf32>,
    } else {
    }
    return
  }
  func.func @transform_0(%arg0: i32, %arg1: i32, %arg2: i32) -> (i32, i32) {
    %c0_i32 = arith.constant 0 : i32
    return %arg0, %arg2 : i32, i32
  }
  func.func @transform_1(%arg0: i32, %arg1: i32, %arg2: i32) -> (i32, i32) {
    %c0_i32 = arith.constant 0 : i32
    return %arg2, %arg1 : i32, i32
  }
  func.func @transform_2(%arg0: i32, %arg1: i32, %arg2: i32) -> (i32, i32) {
    %c0_i32 = arith.constant 0 : i32
    %c0_i32_0 = arith.constant 0 : i32
    return %c0_i32, %arg1 : i32, i32
  }
  func.func @transform_3(%arg0: i32, %arg1: i32, %arg2: i32) -> (i32, i32) {
    %c0_i32 = arith.constant 0 : i32
    return %arg0, %arg1 : i32, i32
  }
}

</mosaic_0001>

<bundles_post_ra>
// kernel: tpu_custom_call.1
= control target key start
LH: loop header
LB: loop body
LE: loop exit
PB: predicated region body
PF: predicated region fallthrough
CT: control target
= control target key end

     0   :  { %8 = vsyncpa [#allocation4], 0  ;;  %s400_s0 = inlined_call_operand.hbm [shape: bf16[16,128], index: 0, kind: input, shape index: {}]   ;;  %s401_s1 = inlined_call_operand.hbm [shape: bf16[128,128], index: 1, kind: input, shape index: {}]   ;;  %s402_s2 = inlined_call_operand.vmem [shape: f32[1,128], index: 2, kind: input, shape index: {}]   ;;  %s403_s3 = inlined_call_operand.hbm [shape: f32[16,128], index: 3, kind: output, shape index: {}]  }
   0x1   :  { %9 = vsyncpa [#allocation7], 0 }
   0x2   :  { %10 = vsyncpa [#allocation5], 0  ;;  %s332_s12 = smov [#allocation3]   ;;  %s260_s16 = scalar_lea.hbm %s400_s0, 128 }
   0x3   :  { %s16_s13 = sshll.u32 %s332_s12, 4  ;;  %p261_p0 = scmp.ne.s32.totalorder %s400_s0, %s260_s16  ;;  %s17_s13 = int_to_ptr.vmem [resolvable:$true] %s16_s13 }
   0x4   :  { %p264_p1 = scmp.lt.u32.totalorder %s260_s16, %s400_s0 }
   0x6   :  { %p266_p2 = pnand %p264_p1, %p261_p0 }
   0x8   :  { %269 = shalt.err (!%p266_p2)
}
   0x9   :  { %s270_s21 = scalar_lea.vmem %s17_s13, 128  ;;  %p275_p4 = scmp.lt.s32.totalorder %s17_s13, %s17_s13 }
   0xa   :  { %p271_p3 = scmp.ne.s32.totalorder %s17_s13, %s270_s21  ;;  %p276_p5 = scmp.lt.s32.totalorder %s270_s21, %s270_s21 }
   0xc   :  { %p277_p6 = por %p276_p5, %p275_p4 }
   0xe   :  { %p278_p7 = pnand %p277_p6, %p271_p3 }
  0x10   :  { %281 = shalt.err (!%p278_p7)
}
  0x11   :  { %s333_s22 = smov 64   ;;  %s334_s23 = smov 4  }
  0x12   :  { %22 = dma.hbm_to_vmem [thread:$0]  %s400_s0, 128, %s17_s13, [#allocation4], %s333_s22, %s333_s22, %s334_s23  }
  0x13   :  { %s335_s26 = smov [#allocation6]   ;;  %s282_s30 = scalar_lea.hbm %s401_s1, 1024 }
  0x14   :  { %s28_s27 = sshll.u32 %s335_s26, 4  ;;  %p283_p8 = scmp.ne.s32.totalorder %s401_s1, %s282_s30  ;;  %s29_s27 = int_to_ptr.vmem [resolvable:$true] %s28_s27 }
  0x15   :  { %p286_p9 = scmp.lt.u32.totalorder %s282_s30, %s401_s1 }
  0x17   :  { %p288_p10 = pnand %p286_p9, %p283_p8 }
  0x19   :  { %291 = shalt.err (!%p288_p10)
}
  0x1a   :  { %s292_s8 = scalar_lea.vmem %s29_s27, 1024  ;;  %p297_p12 = scmp.lt.s32.totalorder %s29_s27, %s29_s27 }
  0x1b   :  { %p293_p11 = scmp.ne.s32.totalorder %s29_s27, %s292_s8  ;;  %p298_p13 = scmp.lt.s32.totalorder %s292_s8, %s292_s8 }
  0x1d   :  { %p299_p0 = por %p298_p13, %p297_p12 }
  0x1f   :  { %p300_p1 = pnand %p299_p0, %p293_p11 }
  0x21   :  { %303 = shalt.err (!%p300_p1)
}
  0x22   :  { %34 = dma.hbm_to_vmem [thread:$0]  %s401_s1, 1024, %s29_s27, [#allocation7], %s333_s22, %s333_s22, %s334_s23  }
  0x23   :  { %326 = dma.done.wait [#allocation4], 128  }
  0x24   :  { %327 = vsyncadd [#allocation4], 4294967168 }
  0x25   :  { %328 = dma.done.wait [#allocation7], 1024  }
  0x26   :  { %329 = vsyncadd [#allocation7], 4294966272  ;;  %v336_v0 = vmov 0.0   ;;  %vm337_vm0 = vmmov 0   ;;  %v251_v1 = vld [vmem:[#allocation6] sm:$0xff]   ;;  %v252_v2 = vld [vmem:[#allocation6 + $0x8] sm:$0xff]  }
  0x27   :  { %222 = vmatprep.subr.bf16.mxu0 %v336_v0  ;;  %238 = vmatprep.mubr.msk.bf16.mxu0 %vm337_vm0, %v336_v0  ;;  %v253_v3 = vld [vmem:[#allocation6 + $0x10] sm:$0xff]   ;;  %v254_v4 = vld [vmem:[#allocation6 + $0x18] sm:$0xff]   ;;  %v255_v5 = vld [vmem:[#allocation6 + $0x20] sm:$0xff]   ;;  %s338_s11 = smov [#allocation8]  }
  0x28   :  { %223 = vmatpush3.bf16.msra.mxu0 %v251_v1  ;;  %v256_v6 = vld [vmem:[#allocation6 + $0x28] sm:$0xff]   ;;  %v257_v7 = vld [vmem:[#allocation6 + $0x30] sm:$0xff]   ;;  %v258_v8 = vld [vmem:[#allocation6 + $0x38] sm:$0xff]   ;;  %s190_s12 = sshll.u32 %s338_s11, 4  ;;  %s191_s12 = int_to_ptr.vmem [resolvable:$true] %s190_s12 }
  0x29   :  { %224 = vmatprep.subr.bf16.mxu0 %v336_v0  ;;  %v259_v9 = vld [vmem:[#allocation3] sm:$0xff]   ;;  %s304_s13 = scalar_lea.vmem %s191_s12, 256  ;;  %p309_p3 = scmp.lt.s32.totalorder %s191_s12, %s191_s12 }
  0x2a   :  { %v212_v10 = vld [vmem:[%s402_s2] ss:$0 sm:$0xff]  ;;  %p305_p2 = scmp.ne.s32.totalorder %s191_s12, %s304_s13  ;;  %p310_p4 = scmp.lt.s32.totalorder %s304_s13, %s304_s13 }
  0x2c   :  { %225 = vmatpush3.bf16.msra.mxu0 %v252_v2  ;;  %p311_p5 = por %p310_p4, %p309_p3 }
  0x2d   :  { %226 = vmatprep.subr.bf16.mxu0 %v336_v0 }
  0x2e   :  { %p312_p6 = pnand %p311_p5, %p305_p2 }
  0x30   :  { %227 = vmatpush3.bf16.msra.mxu0 %v253_v3 }
  0x31   :  { %228 = vmatprep.subr.bf16.mxu0 %v336_v0 }
  0x34   :  { %229 = vmatpush3.bf16.msra.mxu0 %v254_v4 }
  0x35   :  { %230 = vmatprep.subr.bf16.mxu0 %v336_v0 }
  0x38   :  { %231 = vmatpush3.bf16.msra.mxu0 %v255_v5 }
  0x39   :  { %232 = vmatprep.subr.bf16.mxu0 %v336_v0 }
  0x3c   :  { %233 = vmatpush3.bf16.msra.mxu0 %v256_v6 }
  0x3d   :  { %234 = vmatprep.subr.bf16.mxu0 %v336_v0 }
  0x40   :  { %235 = vmatpush3.bf16.msra.mxu0 %v257_v7 }
  0x41   :  { %236 = vmatprep.subr.bf16.mxu0 %v336_v0 }
  0x44   :  { %237 = vmatpush3.bf16.msra.mxu0 %v258_v8 }
  0x47   :  { %239 = vmatmul.mubr.bf16.vlgmr.msra.gmra.mrb[0].mxu0 %v259_v9 }
 0x11a   :  { %v158_v11 = vpop.f32.mrb[0].mxu0 }
 0x11b   :  { %v181_v12 = vadd.f32 %v212_v10, %v158_v11  ;;  %v240_v13 = vpop.f32.mrb[1].mxu0 }
 0x11c   :  { %v161_v14 = vpop.f32.mrb[2].mxu0 }
 0x11d   :  { %183 = vst [vmem:[#allocation8] sm:$0xff] %v181_v12  ;;  %v182_v15 = vadd.f32 %v212_v10, %v161_v14  ;;  %v241_v16 = vpop.f32.mrb[3].mxu0 }
 0x11f   :  { %184 = vst [vmem:[#allocation8 + $0x8] sm:$0xff] %v182_v15 }
 0x120   :  { %315 = shalt.err (!%p312_p6)
}
 0x121   :  { %s316_s15 = scalar_lea.hbm %s403_s3, 256 }
 0x122   :  { %p317_p7 = scmp.ne.s32.totalorder %s403_s3, %s316_s15  ;;  %p320_p8 = scmp.lt.u32.totalorder %s316_s15, %s403_s3 }
 0x124   :  { %p322_p9 = pnand %p320_p8, %p317_p7 }
 0x126   :  { %325 = shalt.err (!%p322_p9)
}
 0x127   :  { %s339_s20 = smov 128   ;;  %s340_s21 = smov 8  }
 0x128   :  { %196 = dma.vmem_to_hbm [thread:$0]  %s191_s12, 256, %s403_s3, [#allocation5], %s339_s20, %s339_s20, %s340_s21  }
 0x129   :  { %330 = dma.done.wait [#allocation5], 256  }
 0x12a   :  { %331 = vsyncadd [#allocation5], 4294967040 }
 0x12b   :  { %200 = vsyncpa [#allocation4], 1 }
 0x12c   :  { %201 = vsyncpa [#allocation7], 1 }
 0x12d   :  { %202 = vsyncpa [#allocation5], 1 }

</bundles_post_ra>
